<compile_context>
chip_gen: v6e
topology: v6e:2x2x1
jax: 0.10.0
libtpu: 0.0.40
codegen_flags: <defaults>
</compile_context>

<pallas_src>
import jax
import jax.numpy as jnp
from jax.experimental import pallas as pl
from jax.experimental.pallas import tpu as pltpu

INPUT_DIM = 11
HIDDEN_DIM = 8
LEAKY_SLOPE = 0.01  # PyTorch nn.LeakyReLU default negative_slope
LANE = 128


def _leaky_relu(x):
    return jnp.where(x > 0, x, LEAKY_SLOPE * x)


def net_kernel(x_ref, w1_ref, b1_ref, w2_ref, b2_ref, wh_ref, bh_ref,
               a_ref, v_ref):
    # Batch-on-lanes layout: x is [11, TILE_B] (bf16), weights are [out, in].
    x = x_ref[...]                                                       # [11, TB] bf16

    # trunk MLP (MXU matmuls accumulate in f32; elementwise math stays f32)
    h1 = jnp.dot(w1_ref[...], x, preferred_element_type=jnp.float32)    # [16, TB]
    h1 = _leaky_relu(h1 + b1_ref[...]).astype(jnp.bfloat16)

    h2 = jnp.dot(w2_ref[...], h1, preferred_element_type=jnp.float32)   # [8, TB]
    h2 = _leaky_relu(h2 + b2_ref[...]).astype(jnp.bfloat16)

    # fused head: rows 0-1 = action logits, row 2 = value
    head = jnp.dot(wh_ref[...], h2, preferred_element_type=jnp.float32) # [3, TB]
    head = head + bh_ref[...]

    logits = head[0:2, :]                                                # [2, TB]
    m = jnp.max(logits, axis=0, keepdims=True)
    e = jnp.exp(logits - m)
    inv = pl.reciprocal(jnp.sum(e, axis=0, keepdims=True), approx=True)  # EUP slot
    a_ref[...] = e * inv                                                 # [2, TB]
    v_ref[...] = head[2:3, :]                                            # [1, TB]


def net_forward(x, params, tile_b_max=1024):
    B = x.shape[0]
    # pad batch up to a multiple of the lane width, then of the tile size
    b_pad = ((B + LANE - 1) // LANE) * LANE
    tile_b = min(tile_b_max, b_pad)
    b_pad = ((b_pad + tile_b - 1) // tile_b) * tile_b
    num_tiles = b_pad // tile_b

    # batch on the lane axis, bf16 input (halves read-side HBM traffic)
    x_t = jnp.zeros((INPUT_DIM, b_pad), jnp.bfloat16)
    x_t = x_t.at[:, :B].set(x.T.astype(jnp.bfloat16))

    w1 = params["w1"].astype(jnp.bfloat16)                               # [16, 11]
    w2 = params["w2"].astype(jnp.bfloat16)                               # [8, 16]
    wh = jnp.concatenate([params["wa"], params["wv"]], axis=0)           # [3, 8]
    wh = wh.astype(jnp.bfloat16)
    bh = jnp.concatenate([params["ba"], params["bv"]], axis=0)           # [3, 1] f32

    def full_spec(shape):
        # constant index_map -> tiny weights stay resident in VMEM
        return pl.BlockSpec(shape, lambda i: (0, 0))

    a_t, v_row = pl.pallas_call(
        net_kernel,
        out_shape=(
            jax.ShapeDtypeStruct((2, b_pad), jnp.float32),
            jax.ShapeDtypeStruct((1, b_pad), jnp.float32),
        ),
        grid=(num_tiles,),
        in_specs=[
            pl.BlockSpec((INPUT_DIM, tile_b), lambda i: (0, i)),
            full_spec(w1.shape), full_spec(params["b1"].shape),
            full_spec(w2.shape), full_spec(params["b2"].shape),
            full_spec(wh.shape), full_spec(bh.shape),
        ],
        out_specs=(
            pl.BlockSpec((2, tile_b), lambda i: (0, i)),
            pl.BlockSpec((1, tile_b), lambda i: (0, i)),
        ),
        compiler_params=pltpu.CompilerParams(
            dimension_semantics=("parallel",)),
    )(x_t, w1, params["b1"], w2, params["b2"], wh, bh)

    a = a_t[:, :B].T                      # [B, 2]
    v_mean = jnp.mean(v_row[0, :B])       # mean over the real batch only
    return a, v_mean


def xavier_normal(key, out_f, in_f):
    # matches nn.init.xavier_normal_ with gain=1; stored as [out, in]
    std = jnp.sqrt(2.0 / (in_f + out_f))
    return jax.random.normal(key, (out_f, in_f), dtype=jnp.float32) * std


def init_params(key):
    k1, k2, k3, k4 = jax.random.split(key, 4)
    h = HIDDEN_DIM
    return {
        "w1": xavier_normal(k1, 2 * h, INPUT_DIM),
        "b1": jnp.zeros((2 * h, 1), jnp.float32),
        "w2": xavier_normal(k2, h, 2 * h),
        "b2": jnp.zeros((h, 1), jnp.float32),
        "wa": xavier_normal(k3, 2, h),
        "ba": jnp.zeros((2, 1), jnp.float32),
        "wv": xavier_normal(k4, 1, h),
        "bv": jnp.zeros((1, 1), jnp.float32),
    }


def net_reference(x, params):
    # pure-JAX f32 reference (PyTorch layout: y = x @ W.T + b)
    h1 = _leaky_relu(x @ params["w1"].T + params["b1"][:, 0])
    h2 = _leaky_relu(h1 @ params["w2"].T + params["b2"][:, 0])
    logits = h2 @ params["wa"].T + params["ba"][:, 0]
    a = jax.nn.softmax(logits, axis=1)
    v = h2 @ params["wv"].T + params["bv"][:, 0]
    return a, jnp.mean(v)


if __name__ == "__main__":
    key = jax.random.PRNGKey(0)
    pkey, xkey = jax.random.split(key)
    params = init_params(pkey)

    batch = 8
    x = jax.random.normal(xkey, (batch, INPUT_DIM), dtype=jnp.float32)

    a, v_mean = net_forward(x, params)
    jax.block_until_ready((a, v_mean))

    assert a.shape == (batch, 2)
    assert v_mean.shape == ()
    # softmax rows sum to ~1 (approx reciprocal -> loose tolerance)
    assert jnp.allclose(jnp.sum(a, axis=1), 1.0, atol=2e-2)

    # compare against pure-JAX f32 reference (bf16 inputs -> loose tolerance)
    a_ref, v_ref = net_reference(x, params)
    assert jnp.allclose(a, a_ref, atol=5e-2), float(jnp.max(jnp.abs(a - a_ref)))
    assert jnp.allclose(v_mean, v_ref, atol=5e-2), float(jnp.abs(v_mean - v_ref))

    print("KERNEL_OK")
</pallas_src>

<mosaic_0001>
module attributes {stable_mosaic.version = 11 : i64} {
  func.func @net_kernel(%arg0: i32, %arg1: memref<11x128xbf16, #tpu.memory_space<vmem>>, %arg2: memref<16x11xbf16, #tpu.memory_space<vmem>>, %arg3: memref<16x1xf32, #tpu.memory_space<vmem>>, %arg4: memref<8x16xbf16, #tpu.memory_space<vmem>>, %arg5: memref<8x1xf32, #tpu.memory_space<vmem>>, %arg6: memref<3x8xbf16, #tpu.memory_space<vmem>>, %arg7: memref<3x1xf32, #tpu.memory_space<vmem>>, %arg8: memref<2x128xf32, #tpu.memory_space<vmem>>, %arg9: memref<1x128xf32, #tpu.memory_space<vmem>>) attributes {dimension_semantics = [#tpu.dimension_semantics<parallel>], iteration_bounds = array<i64: 1>, scalar_prefetch = 0 : i64, scratch_operands = 0 : i64, tpu.core_type = #tpu.core_type<tc>, window_params = [{transform_indices = @transform_0, window_bounds = array<i64: 11, 128>}, {pipeline_mode = #tpu.pipeline_mode<synchronous>, transform_indices = @transform_1, window_bounds = array<i64: 16, 11>}, {pipeline_mode = #tpu.pipeline_mode<synchronous>, transform_indices = @transform_2, window_bounds = array<i64: 16, 1>}, {pipeline_mode = #tpu.pipeline_mode<synchronous>, transform_indices = @transform_3, window_bounds = array<i64: 8, 16>}, {pipeline_mode = #tpu.pipeline_mode<synchronous>, transform_indices = @transform_4, window_bounds = array<i64: 8, 1>}, {pipeline_mode = #tpu.pipeline_mode<synchronous>, transform_indices = @transform_5, window_bounds = array<i64: 3, 8>}, {pipeline_mode = #tpu.pipeline_mode<synchronous>, transform_indices = @transform_6, window_bounds = array<i64: 3, 1>}, {transform_indices = @transform_7, window_bounds = array<i64: 2, 128>}, {transform_indices = @transform_8, window_bounds = array<i64: 1, 128>}]} {
    %c0 = arith.constant 0 : index
    %c0_0 = arith.constant 0 : index
    %0 = vector.load %arg1[%c0, %c0_0] : memref<11x128xbf16, #tpu.memory_space<vmem>>, vector<11x128xbf16>
    %c0_1 = arith.constant 0 : index
    %c0_2 = arith.constant 0 : index
    %1 = vector.load %arg2[%c0_1, %c0_2] : memref<16x11xbf16, #tpu.memory_space<vmem>>, vector<16x11xbf16>
    %cst = arith.constant dense<0.000000e+00> : vector<16x128xf32>
    %2 = tpu.matmul %1, %0, %cst {dimension_numbers = #tpu.dot_dimension_numbers<[1], [0], [0], [1], [0, 0, 1, 1], [], []>} : vector<16x11xbf16>, vector<11x128xbf16>, vector<16x128xf32> -> vector<16x128xf32>
    %c0_3 = arith.constant 0 : index
    %c0_4 = arith.constant 0 : index
    %3 = vector.load %arg3[%c0_3, %c0_4] : memref<16x1xf32, #tpu.memory_space<vmem>>, vector<16x1xf32>
    %4 = vector.broadcast %3 : vector<16x1xf32> to vector<16x128xf32>
    %5 = arith.addf %2, %4 : vector<16x128xf32>
    %cst_5 = arith.constant 0.000000e+00 : f32
    %6 = vector.broadcast %cst_5 : f32 to vector<16x128xf32>
    %7 = arith.cmpf ogt, %5, %6 : vector<16x128xf32>
    %cst_6 = arith.constant 0.00999999977 : f32
    %8 = vector.broadcast %cst_6 : f32 to vector<16x128xf32>
    %9 = arith.mulf %8, %5 : vector<16x128xf32>
    %10 = arith.select %7, %5, %9 : vector<16x128xi1>, vector<16x128xf32>
    %11 = arith.truncf %10 : vector<16x128xf32> to vector<16x128xbf16>
    %c0_7 = arith.constant 0 : index
    %c0_8 = arith.constant 0 : index
    %12 = vector.load %arg4[%c0_7, %c0_8] : memref<8x16xbf16, #tpu.memory_space<vmem>>, vector<8x16xbf16>
    %cst_9 = arith.constant dense<0.000000e+00> : vector<8x128xf32>
    %13 = tpu.matmul %12, %11, %cst_9 {dimension_numbers = #tpu.dot_dimension_numbers<[1], [0], [0], [1], [0, 0, 1, 1], [], []>} : vector<8x16xbf16>, vector<16x128xbf16>, vector<8x128xf32> -> vector<8x128xf32>
    %c0_10 = arith.constant 0 : index
    %c0_11 = arith.constant 0 : index
    %14 = vector.load %arg5[%c0_10, %c0_11] : memref<8x1xf32, #tpu.memory_space<vmem>>, vector<8x1xf32>
    %15 = vector.broadcast %14 : vector<8x1xf32> to vector<8x128xf32>
    %16 = arith.addf %13, %15 : vector<8x128xf32>
    %cst_12 = arith.constant 0.000000e+00 : f32
    %17 = vector.broadcast %cst_12 : f32 to vector<8x128xf32>
    %18 = arith.cmpf ogt, %16, %17 : vector<8x128xf32>
    %cst_13 = arith.constant 0.00999999977 : f32
    %19 = vector.broadcast %cst_13 : f32 to vector<8x128xf32>
    %20 = arith.mulf %19, %16 : vector<8x128xf32>
    %21 = arith.select %18, %16, %20 : vector<8x128xi1>, vector<8x128xf32>
    %22 = arith.truncf %21 : vector<8x128xf32> to vector<8x128xbf16>
    %c0_14 = arith.constant 0 : index
    %c0_15 = arith.constant 0 : index
    %23 = vector.load %arg6[%c0_14, %c0_15] : memref<3x8xbf16, #tpu.memory_space<vmem>>, vector<3x8xbf16>
    %cst_16 = arith.constant dense<0.000000e+00> : vector<3x128xf32>
    %24 = tpu.matmul %23, %22, %cst_16 {dimension_numbers = #tpu.dot_dimension_numbers<[1], [0], [0], [1], [0, 0, 1, 1], [], []>} : vector<3x8xbf16>, vector<8x128xbf16>, vector<3x128xf32> -> vector<3x128xf32>
    %c0_17 = arith.constant 0 : index
    %c0_18 = arith.constant 0 : index
    %25 = vector.load %arg7[%c0_17, %c0_18] : memref<3x1xf32, #tpu.memory_space<vmem>>, vector<3x1xf32>
    %26 = vector.broadcast %25 : vector<3x1xf32> to vector<3x128xf32>
    %27 = arith.addf %24, %26 : vector<3x128xf32>
    %28 = vector.extract_strided_slice %27 {offsets = [0, 0], sizes = [2, 128], strides = [1, 1]} : vector<3x128xf32> to vector<2x128xf32>
    %cst_19 = arith.constant dense<0xFF800000> : vector<128xf32>
    %29 = vector.multi_reduction <maximumf>, %28, %cst_19 [0] : vector<2x128xf32> to vector<128xf32>
    %30 = vector.shape_cast %29 : vector<128xf32> to vector<1x128xf32>
    %31 = vector.broadcast %30 : vector<1x128xf32> to vector<2x128xf32>
    %32 = arith.subf %28, %31 : vector<2x128xf32>
    %33 = math.exp %32 : vector<2x128xf32>
    %cst_20 = arith.constant dense<0.000000e+00> : vector<128xf32>
    %34 = vector.multi_reduction <add>, %33, %cst_20 [0] : vector<2x128xf32> to vector<128xf32>
    %35 = vector.shape_cast %34 : vector<128xf32> to vector<1x128xf32>
    %36 = tpu.reciprocal %35 {approx = true} : vector<1x128xf32> -> vector<1x128xf32>
    %37 = vector.broadcast %36 : vector<1x128xf32> to vector<2x128xf32>
    %38 = arith.mulf %33, %37 : vector<2x128xf32>
    %c0_21 = arith.constant 0 : index
    %c0_22 = arith.constant 0 : index
    %39 = vector.load %arg8[%c0_21, %c0_22] : memref<2x128xf32, #tpu.memory_space<vmem>>, vector<2x128xf32>
    tpu.vector_store %arg8[%c0_21, %c0_22], %38 {strides = array<i32>} : memref<2x128xf32, #tpu.memory_space<vmem>>, vector<2x128xf32>,
    %40 = vector.extract_strided_slice %27 {offsets = [2, 0], sizes = [1, 128], strides = [1, 1]} : vector<3x128xf32> to vector<1x128xf32>
    %c0_23 = arith.constant 0 : index
    %c0_24 = arith.constant 0 : index
    %41 = vector.load %arg9[%c0_23, %c0_24] : memref<1x128xf32, #tpu.memory_space<vmem>>, vector<1x128xf32>
    tpu.vector_store %arg9[%c0_23, %c0_24], %40 {strides = array<i32>} : memref<1x128xf32, #tpu.memory_space<vmem>>, vector<1x128xf32>,
    return
  }
  func.func @transform_0(%arg0: i32) -> (i32, i32) {
    %c0_i32 = arith.constant 0 : i32
    %c0_i32_0 = arith.constant 0 : i32
    return %c0_i32, %arg0 : i32, i32
  }
  func.func @transform_1(%arg0: i32) -> (i32, i32) {
    %c0_i32 = arith.constant 0 : i32
    %c0_i32_0 = arith.constant 0 : i32
    %c0_i32_1 = arith.constant 0 : i32
    return %c0_i32, %c0_i32_0 : i32, i32
  }
  func.func @transform_2(%arg0: i32) -> (i32, i32) {
    %c0_i32 = arith.constant 0 : i32
    %c0_i32_0 = arith.constant 0 : i32
    %c0_i32_1 = arith.constant 0 : i32
    return %c0_i32, %c0_i32_0 : i32, i32
  }
  func.func @transform_3(%arg0: i32) -> (i32, i32) {
    %c0_i32 = arith.constant 0 : i32
    %c0_i32_0 = arith.constant 0 : i32
    %c0_i32_1 = arith.constant 0 : i32
    return %c0_i32, %c0_i32_0 : i32, i32
  }
  func.func @transform_4(%arg0: i32) -> (i32, i32) {
    %c0_i32 = arith.constant 0 : i32
    %c0_i32_0 = arith.constant 0 : i32
    %c0_i32_1 = arith.constant 0 : i32
    return %c0_i32, %c0_i32_0 : i32, i32
  }
  func.func @transform_5(%arg0: i32) -> (i32, i32) {
    %c0_i32 = arith.constant 0 : i32
    %c0_i32_0 = arith.constant 0 : i32
    %c0_i32_1 = arith.constant 0 : i32
    return %c0_i32, %c0_i32_0 : i32, i32
  }
  func.func @transform_6(%arg0: i32) -> (i32, i32) {
    %c0_i32 = arith.constant 0 : i32
    %c0_i32_0 = arith.constant 0 : i32
    %c0_i32_1 = arith.constant 0 : i32
    return %c0_i32, %c0_i32_0 : i32, i32
  }
  func.func @transform_7(%arg0: i32) -> (i32, i32) {
    %c0_i32 = arith.constant 0 : i32
    %c0_i32_0 = arith.constant 0 : i32
    return %c0_i32, %arg0 : i32, i32
  }
  func.func @transform_8(%arg0: i32) -> (i32, i32) {
    %c0_i32 = arith.constant 0 : i32
    %c0_i32_0 = arith.constant 0 : i32
    return %c0_i32, %arg0 : i32, i32
  }
}

</mosaic_0001>

<bundles_post_ra>
// kernel: tpu_custom_call.1
= control target key start
LH: loop header
LB: loop body
LE: loop exit
PB: predicated region body
PF: predicated region fallthrough
CT: control target
= control target key end

     0   :  { %14 = vsyncpa [#allocation3], 0  ;;  %vm61_vm0 = vcmask 1044480   ;;  %v363_v0 = vmov 0.0   ;;  %vm62_vm1 = vcmask 1045504   ;;  %v364_v2 = vmov 65535   ;;  %s449_s0 = inlined_call_operand.vmem [shape: bf16[11,128], index: 0, kind: input, shape index: {}]   ;;  %s450_s1 = inlined_call_operand.vmem [shape: bf16[16,11], index: 1, kind: input, shape index: {}]   ;;  %s451_s2 = inlined_call_operand.vmem [shape: f32[16,1], index: 2, kind: input, shape index: {}]   ;;  %s452_s3 = inlined_call_operand.vmem [shape: bf16[8,16], index: 3, kind: input, shape index: {}]   ;;  %s453_s4 = inlined_call_operand.vmem [shape: f32[8,1], index: 4, kind: input, shape index: {}]   ;;  %s454_s5 = inlined_call_operand.vmem [shape: bf16[3,8], index: 5, kind: input, shape index: {}]   ;;  %s455_s6 = inlined_call_operand.vmem [shape: f32[3,1], index: 6, kind: input, shape index: {}]   ;;  %s456_s7 = inlined_call_operand.hbm [shape: f32[2,128], index: 7, kind: output, shape index: {0}]   ;;  %s457_s8 = inlined_call_operand.hbm [shape: f32[1,128], index: 8, kind: output, shape index: {1}]  }
   0x1   :  { %287 = vmatprep.subr.bf16.mxu0 %v363_v0  ;;  %v313_v1 = vld [vmem:[%s449_s0] sm:$0x3f]   ;;  %293 = vmatprep.subr.bf16.mxu1 %v363_v0  ;;  %v63_v3 = vsel %vm61_vm0, 4294967295, %v364_v2  ;;  %vm365_vm2 = vmmov 0  }
   0x2   :  { %289 = vmatprep.mubr.msk.bf16.mxu0 %vm365_vm2, %v363_v0  ;;  %295 = vmatprep.mubr.msk.bf16.mxu1 %vm365_vm2, %v363_v0  ;;  %v64_v4 = vsel %vm62_vm1, %v63_v3, 0  ;;  %v35_v5 = vld [vmem:[%s451_s2] sm:$0xff] }
   0x3   :  { %15 = vsyncpa [#allocation5], 0  ;;  %v66_v6 = vand.u32 %v313_v1, %v64_v4  ;;  %v366_v7 = vmov 0   ;;  %v314_v8 = vld [vmem:[%s450_s1] sm:$0xff]   ;;  %vm57_vm3 = vcmask 89088   ;;  %v36_v9 = vld [vmem:[%s451_s2 + $0x8] sm:$0xff] }
   0x4   :  { %311 = vset.pattern.permute.xlu0 %v366_v7  ;;  %312 = vset.pattern.permute.xlu1 %v366_v7  ;;  %v117_v10 = vld [vmem:[%s453_s4] sm:$0xff]  ;;  %vm123_vm6 = vcmask 130048   ;;  %vm182_vm8 = vcmask 1043456   ;;  %vm178_vm9 = vcmask 64512   ;;  %vm226_vm10 = vcmask 1041408  }
   0x5   :  { %39 = vperm.xlu0 %311, %v35_v5   ;;  %288 = vmatpush3.bf16.msra.mxu0 %v66_v6  ;;  %v172_v11 = vld [vmem:[%s455_s6] sm:$0x7] }
   0x6   :  { %299 = vmatprep.subr.bf16.mxu0 %v363_v0  ;;  %120 = vperm.xlu1 %312, %v117_v10   ;;  %v116_v25 = vld [vmem:[%s452_s3] sm:$0xf]  ;;  %s367_s3 = smov [#allocation4]  }
   0x7   :  { %v171_v36 = vld [vmem:[%s454_s5] sm:$0x3]  ;;  %s264_s16 = sshll.u32 %s367_s3, 4  ;;  %s265_s16 = int_to_ptr.vmem [resolvable:$true] %s264_s16 }
   0x8   :  { %290 = vmatmul.mubr.msk.bf16.vlgmr.msra.gmra.mxu0 %vm57_vm3, %v314_v8  ;;  %s319_s17 = scalar_lea.vmem %s265_s16, 16  ;;  %s323_s18 = scalar_lea.vmem %s265_s16, 32 }
   0x9   :  { %44 = vperm.xlu0 %311, %v36_v9   ;;  %301 = vmatprep.mubr.msk.bf16.mxu0 %vm365_vm2, %v363_v0  ;;  %p320_p0 = scmp.ne.s32.totalorder %s265_s16, %s319_s17  ;;  %p324_p1 = scmp.lt.s32.totalorder %s265_s16, %s265_s16 }
   0xa   :  { %175 = vperm.xlu1 %312, %v172_v11   ;;  %p325_p2 = scmp.lt.s32.totalorder %s323_s18, %s319_s17 }
   0xc   :  { %p326_p3 = por %p325_p2, %p324_p1 }
   0xe   :  { %p327_p4 = pnand %p326_p3, %p320_p0 }
  0x80   :  { %v40_v12 = vpop.permute.xlu0 %39 }
  0x81   :  { %v121_v26 = vpop.permute.xlu1 %120 }
  0x84   :  { %v45_v16 = vpop.permute.xlu0 %44 }
  0x85   :  { %v176_v37 = vpop.permute.xlu1 %175 }
  0xc8   :  { %v102_v13 = vpop.f32.mrf.mxu0 }
  0xc9   :  { %v103_v14 = vadd.f32 %v102_v13, %v40_v12 }
  0xca   :  { %v291_v15 = vpop.f32.mrf.mxu0 }
  0xcb   :  { %v111_v18 = vmul.f32 0.01, %v103_v14  ;;  %vm109_vm4 = vcmp.gt.f32.partialorder %v103_v14, 0.0 }
  0xcc   :  { %v105_v17 = vpop.f32.mrf.mxu0 }
  0xcd   :  { %v106_v19 = vadd.f32 %v105_v17, %v45_v16  ;;  %v113_v22 = vsel %vm109_vm4, %v103_v14, %v111_v18 }
  0xce   :  { %v292_v20 = vpop.f32.mrf.mxu0 }
  0xcf   :  { %v112_v21 = vmul.f32 0.01, %v106_v19  ;;  %vm110_vm5 = vcmp.gt.f32.partialorder %v106_v19, 0.0 }
  0xd1   :  { %v114_v23 = vsel %vm110_vm5, %v106_v19, %v112_v21 }
  0xd2   :  { %v115_v24 = vpack.c.bf16 %v114_v23, %v113_v22 }
  0xd4   :  { %294 = vmatpush3.bf16.msra.mxu1 %v115_v24 }
  0xd7   :  { %296 = vmatmul.mubr.msk.bf16.vlgmr.msra.gmra.mxu1 %vm123_vm6, %v116_v25 }
 0x197   :  { %v161_v27 = vpop.f32.mrf.mxu1 }
 0x198   :  { %v162_v28 = vadd.f32 %v161_v27, %v121_v26 }
 0x199   :  { %v297_v29 = vpop.f32.mrf.mxu1 }
 0x19a   :  { %vm167_vm7 = vcmp.gt.f32.partialorder %v162_v28, 0.0  ;;  %v168_v30 = vmul.f32 0.01, %v162_v28 }
 0x19b   :  { %v164_v31 = vpop.f32.mrf.mxu1 }
 0x19c   :  { %v169_v32 = vsel %vm167_vm7, %v162_v28, %v168_v30 }
 0x19d   :  { %v170_v33 = vpack.c.bf16 %v169_v32, %v169_v32  ;;  %v298_v34 = vpop.f32.mrf.mxu1 }
 0x19f   :  { %v184_v35 = vsel %vm182_vm8, %v170_v33, 0 }
 0x1a0   :  { %300 = vmatpush3.bf16.msra.mxu0 %v184_v35 }
 0x1a3   :  { %302 = vmatmul.mubr.msk.bf16.vlgmr.msra.gmra.mxu0 %vm178_vm9, %v171_v36 }
 0x263   :  { %v220_v38 = vpop.f32.mrf.mxu0 }
 0x264   :  { %v221_v39 = vadd.f32 %v220_v38, %v176_v37 }
 0x265   :  { %v303_v40 = vpop.f32.mrf.mxu0 }
 0x266   :  { %v227_v41 = vsel %vm226_vm10, %v221_v39, -inf  ;;  %247 = vst [vmem:[#allocation4 - $0x2] sm:$0x4] %v221_v39 }
 0x267   :  { %v228_v42 = vrot.slane %v227_v41, 4  ;;  %v223_v43 = vpop.f32.mrf.mxu0 }
 0x268   :  { %330 = shalt.err (!%p327_p4)
}
 0x269   :  { %267 = dma.vmem_to_hbm [thread:$0]  %s265_s16, 16, %s457_s8, [#allocation5]   ;;  %v229_v44 = vmax.f32 %v227_v41, %v228_v42  ;;  %v304_v45 = vpop.f32.mrf.mxu0 }
 0x26a   :  { %s368_s8 = smov [#allocation2]  }
 0x26b   :  { %v230_v46 = vrot.slane %v229_v44, 2  ;;  %s254_s20 = sshll.u32 %s368_s8, 4  ;;  %s255_s20 = int_to_ptr.vmem [resolvable:$true] %s254_s20 }
 0x26c   :  { %s339_s21 = scalar_lea.vmem %s255_s20, 32  ;;  %p344_p6 = scmp.lt.s32.totalorder %s255_s20, %s255_s20 }
 0x26d   :  { %v231_v47 = vmax.f32 %v229_v44, %v230_v46  ;;  %p340_p5 = scmp.ne.s32.totalorder %s255_s20, %s339_s21  ;;  %p345_p7 = scmp.lt.s32.totalorder %s339_s21, %s339_s21 }
 0x26f   :  { %v232_v48 = vrot.slane %v231_v47, 1  ;;  %p346_p8 = por %p345_p7, %p344_p6 }
 0x271   :  { %v233_v49 = vmax.f32 %v231_v47, %v232_v48  ;;  %p347_p9 = pnand %p346_p8, %p340_p5 }
 0x273   :  { %v234_v50 = vsub.f32 %v221_v39, %v233_v49 }
 0x275   :  { %v235_v51 = vmul.f32 1.442695, %v234_v50 }
 0x277   :  { %315 = vpow2.f32 %v235_v51 }
 0x284   :  { %v316_v52 = vpop.eup %315 }
 0x285   :  { %v237_v53 = vsel %vm226_vm10, %v316_v52, 0.0 }
 0x286   :  { %v238_v54 = vrot.slane %v237_v53, 4 }
 0x288   :  { %v239_v55 = vadd.f32 %v238_v54, %v237_v53 }
 0x28a   :  { %v240_v56 = vrot.slane %v239_v55, 2 }
 0x28c   :  { %v241_v57 = vadd.f32 %v240_v56, %v239_v55 }
 0x28e   :  { %v242_v58 = vrot.slane %v241_v57, 1 }
 0x290   :  { %v243_v59 = vadd.f32 %v242_v58, %v241_v57 }
 0x292   :  { %317 = vrcp.f32 %v243_v59 }
 0x29f   :  { %v318_v60 = vpop.eup %317 }
 0x2a0   :  { %v245_v61 = vmul.f32 %v318_v60, %v316_v52 }
 0x2a2   :  { %246 = vst [vmem:[#allocation2] sm:$0x3] %v245_v61 }
 0x2a3   :  { %350 = shalt.err (!%p347_p9)
}
 0x2a4   :  { %257 = dma.vmem_to_hbm [thread:$0]  %s255_s20, 32, %s456_s7, [#allocation3]  }
 0x2a5   :  { %359 = dma.done.wait [#allocation3], 32  }
 0x2a6   :  { %360 = vsyncadd [#allocation3], 4294967264 }
 0x2a7   :  { %361 = dma.done.wait [#allocation5], 16  }
 0x2a8   :  { %362 = vsyncadd [#allocation5], 4294967280 }
 0x2a9   :  { %274 = vsyncpa [#allocation3], 1 }
 0x2aa   :  { %275 = vsyncpa [#allocation5], 1 }

</bundles_post_ra>
